<compile_context>
chip_gen: v7x
topology: tpu7x:2x2x1
jax: 0.10.0
libtpu: 0.0.40
codegen_flags: <defaults>
</compile_context>

<pallas_src>
import functools

import jax
import jax.numpy as jnp
from jax.experimental import pallas as pl
from jax.experimental.pallas import tpu as pltpu


def _round_up(x, m):
    return ((x + m - 1) // m) * m


def _vq_kernel(z_ref, emb_ref, esq_ref, q_ref, sse_ref, *,
               tn, tc, n_valid, n_total, use_bf16, assume_no_ties):
    """One grid step: a (TN, D) tile of flattened z against the padded
    (K_pad, D) codebook, processed in TC-row chunks so MXU and XLU overlap."""
    i = pl.program_id(0)

    e = emb_ref[...].astype(jnp.float32)            # (K_pad, D), pad rows zero
    e_sq = esq_ref[...]                             # (1, K_pad), pad cols huge
    k_pad, d = e.shape
    e_mm = e.astype(jnp.bfloat16) if use_bf16 else e

    # (1, K_pad) iota, broadcast inside the compares; never materialize a
    # (TC, K_pad) int32 tensor.
    col = jax.lax.broadcasted_iota(jnp.int32, (1, k_pad), 1)
    need_mask = n_valid < n_total
    local_row = jax.lax.broadcasted_iota(jnp.int32, (tc, 1), 0)   # hoisted

    n_chunks = tn // tc

    def chunk(c, acc):
        off = pl.multiple_of(c * tc, tc)
        z = z_ref[pl.ds(off, tc), :].astype(jnp.float32)          # (TC, D)
        z_mm = z.astype(jnp.bfloat16) if use_bf16 else z

        # argmin_j ||z - e_j||^2 == argmin_j (||e_j||^2 - 2 z.e_j); the per-row
        # ||z||^2 term is constant over j and is dropped entirely.
        cross = jnp.dot(z_mm, e_mm.T,
                        preferred_element_type=jnp.float32)       # (TC, K_pad)
        dist = e_sq - 2.0 * cross                                 # (TC, K_pad)

        min_d = jnp.min(dist, axis=1, keepdims=True)              # (TC, 1)
        if assume_no_ties:
            # Single XLU reduction; would sum codewords on an exact tie, so
            # this stays opt-in.
            onehot = (dist == min_d).astype(jnp.float32)
        else:
            # Exact torch.argmin first-index tie-break (two reductions).
            idx = jnp.min(jnp.where(dist == min_d, col, k_pad),
                          axis=1, keepdims=True)                  # (TC, 1)
            onehot = (col == idx).astype(jnp.float32)             # (TC, K_pad)

        # Gather via one-hot matmul in f32 -> bit-exact codebook rows.
        quant = jnp.dot(onehot, e, preferred_element_type=jnp.float32)  # (TC, D)
        q_ref[pl.ds(off, tc), :] = quant.astype(q_ref.dtype)

        diff = quant - z
        if need_mask:                                             # pad rows of z
            row = local_row + (i * tn + off)
            diff = diff * (row < n_valid).astype(jnp.float32)
        return acc + diff * diff                                  # pure VPU

    acc = jax.lax.fori_loop(0, n_chunks, chunk,
                            jnp.zeros((tc, d), jnp.float32), unroll=True)
    # One sublane reduce per tile; lane reduction finished in the wrapper.
    sse_ref[...] = jnp.sum(acc, axis=0, keepdims=True).reshape(sse_ref.shape)


def _choose_tiles(n_rows, d, k_pad, vmem_budget_bytes=16 * 1024 * 1024,
                  cap=4096, chunk=512, min_steps=8):
    """Pick (row tile TN, inner chunk TC).

    Honest VMEM estimate: the double-buffered z/q tiles grow with TN, while the
    (chunk, K_pad) matmul/argmin intermediates are bounded by the chunk size."""
    bytes_per_row = 4 * (2 * d + 2 * d)                 # 2x z bufs + 2x q bufs (f32)
    fixed = 4 * (2 * k_pad * d + k_pad                  # codebook bufs + ||e||^2
                 + 6 * chunk * k_pad + 2 * chunk * d)   # chunk intermediates + acc
    tn = cap
    while tn > 8 and fixed + tn * bytes_per_row > vmem_budget_bytes:
        tn //= 2
    # Keep >= min_steps grid steps on big problems so ("parallel",) can shard
    # across v7x's two TensorCores and the DMA pipeline has work to overlap.
    if n_rows >= min_steps * chunk:
        tn = min(tn, _round_up(pl.cdiv(n_rows, min_steps), 8))
    # Don't pad tiny problems up to a huge tile.
    tn = min(tn, _round_up(n_rows, 8))
    tn = max(8, tn)
    tc = min(chunk, tn)
    tn = _round_up(tn, tc)          # TN must be a multiple of the chunk size
    return tn, tc


@functools.partial(jax.jit, static_argnames=("commitment_cost",
                                             "use_bf16_distances",
                                             "assume_no_ties"))
def vector_quantizer_forward(z, embedding, commitment_cost=0.25,
                             use_bf16_distances=False, assume_no_ties=False):
    """z: (B, H, W, D) float32 (channel-last). embedding: (K, D) float32.
    Returns (quantized with same shape/dtype as z, scalar loss)."""
    K, D = embedding.shape
    orig_shape = z.shape
    z_flat = z.reshape(-1, D)
    N = z_flat.shape[0]

    # Codebook padded to a lane-dense width (multiple of 128). Note: do NOT pad
    # small K up to 256 on v6e/v7x — that doubles VPU/XLU work for no MXU gain;
    # production codebooks with K >= 256 already land on wider multiples.
    K_pad = max(128, _round_up(K, 128))
    emb_pad = embedding if K_pad == K else jnp.pad(embedding,
                                                   ((0, K_pad - K), (0, 0)))
    # ||e||^2 hoisted out of the kernel; pad columns huge so they never win.
    e_sq = jnp.sum(embedding.astype(jnp.float32) ** 2, axis=1)        # (K,)
    e_sq_pad = jnp.full((1, K_pad), jnp.float32(1e30)).at[0, :K].set(e_sq)

    TN, TC = _choose_tiles(N, D, K_pad)
    N_pad = _round_up(N, TN)
    if N_pad != N:
        z_flat = jnp.pad(z_flat, ((0, N_pad - N), (0, 0)))
    num_tiles = N_pad // TN

    kernel = functools.partial(_vq_kernel, tn=TN, tc=TC, n_valid=N,
                               n_total=N_pad,
                               use_bf16=bool(use_bf16_distances),
                               assume_no_ties=bool(assume_no_ties))

    cost = pl.CostEstimate(
        flops=int(4 * N_pad * K_pad * D),        # distance + one-hot matmuls
        transcendentals=0,
        bytes_accessed=int(2 * N_pad * D * 4     # z in + q out
                           + K_pad * D * 4       # codebook
                           + K_pad * 4           # ||e||^2
                           + num_tiles * D * 4)) # SSE partials

    quant_flat, sse_partials = pl.pallas_call(
        kernel,
        out_shape=(
            jax.ShapeDtypeStruct((N_pad, D), z.dtype),
            jax.ShapeDtypeStruct((num_tiles, 1, D), jnp.float32),
        ),
        grid_spec=pltpu.PrefetchScalarGridSpec(
            num_scalar_prefetch=0,
            grid=(num_tiles,),
            in_specs=[
                pl.BlockSpec((TN, D), lambda i: (i, 0)),       # z tile
                pl.BlockSpec((K_pad, D), lambda i: (0, 0)),    # padded codebook
                pl.BlockSpec((1, K_pad), lambda i: (0, 0)),    # hoisted ||e||^2
            ],
            out_specs=[
                pl.BlockSpec((TN, D), lambda i: (i, 0)),       # quantized tile
                pl.BlockSpec((1, 1, D), lambda i: (i, 0, 0)),  # per-lane SSE
            ],
        ),
        compiler_params=pltpu.CompilerParams(
            dimension_semantics=("parallel",),   # no cross-iteration state
            vmem_limit_bytes=32 * 1024 * 1024),
        cost_estimate=cost,
    )(z_flat, emb_pad, e_sq_pad)

    sse = jnp.sum(sse_partials)
    mse = sse / (N * D)
    e_latent_loss = mse                      # mse(quantized.detach(), z)
    q_latent_loss = mse                      # mse(quantized, z.detach())
    loss = q_latent_loss + commitment_cost * e_latent_loss
    # Straight-through estimator: forward value equals quantized.
    quantized = quant_flat[:N].reshape(orig_shape)
    # TODO(synk): backward (stop_gradient split + straight-through grad) would
    # need a custom_vjp; forward values match the PyTorch module.
    return quantized, loss


def _reference(z, embedding, commitment_cost=0.25):
    """Pure-JAX reference mirroring the PyTorch forward."""
    D = embedding.shape[1]
    z_flat = z.reshape(-1, D)
    dist = (jnp.sum(z_flat ** 2, axis=1, keepdims=True)
            + jnp.sum(embedding ** 2, axis=1)
            - 2.0 * z_flat @ embedding.T)
    idx = jnp.argmin(dist, axis=1)
    quant = embedding[idx].reshape(z.shape)
    mse = jnp.mean((quant - z) ** 2)
    loss = mse + commitment_cost * mse
    return quant, loss


if __name__ == "__main__":
    key = jax.random.PRNGKey(0)
    k_z, k_e = jax.random.split(key)

    B, H, W = 2, 8, 8
    num_embeddings, embedding_dim = 64, 32
    commitment_cost = 0.25

    # Deterministic parameter init: uniform(-1/K, 1/K), as in the module.
    embedding = jax.random.uniform(
        k_e, (num_embeddings, embedding_dim), dtype=jnp.float32,
        minval=-1.0 / num_embeddings, maxval=1.0 / num_embeddings)

    # layout: (B, H, W, D) channel-last latent.
    z = jax.random.normal(k_z, (B, H, W, embedding_dim), dtype=jnp.float32)

    quantized, loss = vector_quantizer_forward(
        z, embedding, commitment_cost=commitment_cost)
    jax.block_until_ready((quantized, loss))

    q_ref, loss_ref = _reference(z, embedding, commitment_cost)
    assert quantized.shape == z.shape and quantized.dtype == z.dtype
    assert jnp.allclose(quantized, q_ref, atol=1e-5), "quantized mismatch"
    assert jnp.allclose(loss, loss_ref, atol=1e-6), "loss mismatch"

    print("KERNEL_OK")
</pallas_src>

<mosaic_0001>
module attributes {stable_mosaic.version = 11 : i64} {
  func.func @_vq_kernel(%arg0: i32, %arg1: memref<128x32xf32, #tpu.memory_space<vmem>>, %arg2: memref<128x32xf32, #tpu.memory_space<vmem>>, %arg3: memref<1x128xf32, #tpu.memory_space<vmem>>, %arg4: memref<128x32xf32, #tpu.memory_space<vmem>>, %arg5: memref<1x1x32xf32, #tpu.memory_space<vmem>>) attributes {dimension_semantics = [#tpu.dimension_semantics<parallel>], iteration_bounds = array<i64: 1>, scalar_prefetch = 0 : i64, scratch_operands = 0 : i64, tpu.core_type = #tpu.core_type<tc>, window_params = [{transform_indices = @transform_0, window_bounds = array<i64: 128, 32>}, {pipeline_mode = #tpu.pipeline_mode<synchronous>, transform_indices = @transform_1, window_bounds = array<i64: 128, 32>}, {pipeline_mode = #tpu.pipeline_mode<synchronous>, transform_indices = @transform_2, window_bounds = array<i64: 1, 128>}, {transform_indices = @transform_3, window_bounds = array<i64: 128, 32>}, {transform_indices = @transform_4, window_bounds = array<i64: 1, 1, 32>}]} {
    %c0 = arith.constant 0 : index
    %c0_0 = arith.constant 0 : index
    %0 = vector.load %arg2[%c0, %c0_0] : memref<128x32xf32, #tpu.memory_space<vmem>>, vector<128x32xf32>
    %c0_1 = arith.constant 0 : index
    %c0_2 = arith.constant 0 : index
    %1 = vector.load %arg3[%c0_1, %c0_2] : memref<1x128xf32, #tpu.memory_space<vmem>>, vector<1x128xf32>
    %2 = tpu.iota {dimensions = array<i32: 1>} : vector<1x128xi32>
    %cst = arith.constant 0.000000e+00 : f32
    %3 = vector.broadcast %cst : f32 to vector<128x32xf32>
    %c0_i32 = arith.constant 0 : i32
    %c128_i32 = arith.constant 128 : i32
    %4 = arith.muli %c0_i32, %c128_i32 : i32
    %5 = tpu.assume_multiple %4, 128 : i32
    %6 = arith.index_cast %5 : i32 to index
    %c0_3 = arith.constant 0 : index
    %7 = vector.load %arg1[%6, %c0_3] : memref<128x32xf32, #tpu.memory_space<vmem>>, vector<128x32xf32>
    %8 = tpu.transpose %0, [1, 0] : vector<128x32xf32> -> vector<32x128xf32>
    %cst_4 = arith.constant dense<0.000000e+00> : vector<128x128xf32>
    %9 = tpu.matmul %7, %8, %cst_4 {dimension_numbers = #tpu.dot_dimension_numbers<[1], [0], [0], [1], [0, 0, 1, 1], [], []>} : vector<128x32xf32>, vector<32x128xf32>, vector<128x128xf32> -> vector<128x128xf32>
    %cst_5 = arith.constant 2.000000e+00 : f32
    %10 = vector.broadcast %cst_5 : f32 to vector<128x128xf32>
    %11 = arith.mulf %10, %9 : vector<128x128xf32>
    %12 = vector.broadcast %1 : vector<1x128xf32> to vector<128x128xf32>
    %13 = arith.subf %12, %11 : vector<128x128xf32>
    %cst_6 = arith.constant dense<0x7F800000> : vector<128xf32>
    %14 = vector.multi_reduction <minimumf>, %13, %cst_6 [1] : vector<128x128xf32> to vector<128xf32>
    %15 = vector.shape_cast %14 : vector<128xf32> to vector<128x1xf32>
    %16 = vector.broadcast %15 : vector<128x1xf32> to vector<128x128xf32>
    %17 = arith.cmpf oeq, %13, %16 : vector<128x128xf32>
    %c128_i32_7 = arith.constant 128 : i32
    %18 = vector.shape_cast %2 : vector<1x128xi32> to vector<1x128xi32>
    %19 = vector.broadcast %18 : vector<1x128xi32> to vector<128x128xi32>
    %20 = vector.broadcast %c128_i32_7 : i32 to vector<128x128xi32>
    %21 = arith.select %17, %19, %20 : vector<128x128xi1>, vector<128x128xi32>
    %cst_8 = arith.constant dense<2147483647> : vector<128xi32>
    %22 = vector.multi_reduction <minsi>, %21, %cst_8 [1] : vector<128x128xi32> to vector<128xi32>
    %23 = vector.shape_cast %22 : vector<128xi32> to vector<128x1xi32>
    %24 = vector.broadcast %2 : vector<1x128xi32> to vector<128x128xi32>
    %25 = vector.broadcast %23 : vector<128x1xi32> to vector<128x128xi32>
    %26 = arith.cmpi eq, %24, %25 : vector<128x128xi32>
    %27 = arith.extui %26 : vector<128x128xi1> to vector<128x128xi32>
    %28 = arith.sitofp %27 : vector<128x128xi32> to vector<128x128xf32>
    %cst_9 = arith.constant dense<0.000000e+00> : vector<128x32xf32>
    %29 = tpu.matmul %28, %0, %cst_9 {dimension_numbers = #tpu.dot_dimension_numbers<[1], [0], [0], [1], [0, 0, 1, 1], [], []>} : vector<128x128xf32>, vector<128x32xf32>, vector<128x32xf32> -> vector<128x32xf32>
    %30 = arith.index_cast %5 : i32 to index
    %c0_10 = arith.constant 0 : index
    %31 = vector.load %arg4[%30, %c0_10] : memref<128x32xf32, #tpu.memory_space<vmem>>, vector<128x32xf32>
    tpu.vector_store %arg4[%30, %c0_10], %29 {strides = array<i32>} : memref<128x32xf32, #tpu.memory_space<vmem>>, vector<128x32xf32>,
    %32 = arith.subf %29, %7 : vector<128x32xf32>
    %33 = arith.mulf %32, %32 : vector<128x32xf32>
    %34 = arith.addf %3, %33 : vector<128x32xf32>
    %c1_i32 = arith.constant 1 : i32
    %cst_11 = arith.constant dense<0.000000e+00> : vector<32xf32>
    %35 = vector.multi_reduction <add>, %34, %cst_11 [0] : vector<128x32xf32> to vector<32xf32>
    %36 = vector.shape_cast %35 : vector<32xf32> to vector<1x32xf32>
    %37 = vector.shape_cast %36 : vector<1x32xf32> to vector<1x1x32xf32>
    %c0_12 = arith.constant 0 : index
    %c0_13 = arith.constant 0 : index
    %c0_14 = arith.constant 0 : index
    %38 = vector.load %arg5[%c0_12, %c0_13, %c0_14] : memref<1x1x32xf32, #tpu.memory_space<vmem>>, vector<1x1x32xf32>
    tpu.vector_store %arg5[%c0_12, %c0_13, %c0_14], %37 {strides = array<i32>} : memref<1x1x32xf32, #tpu.memory_space<vmem>>, vector<1x1x32xf32>,
    return
  }
  func.func @transform_0(%arg0: i32) -> (i32, i32) {
    %c0_i32 = arith.constant 0 : i32
    %c0_i32_0 = arith.constant 0 : i32
    return %arg0, %c0_i32 : i32, i32
  }
  func.func @transform_1(%arg0: i32) -> (i32, i32) {
    %c0_i32 = arith.constant 0 : i32
    %c0_i32_0 = arith.constant 0 : i32
    %c0_i32_1 = arith.constant 0 : i32
    return %c0_i32, %c0_i32_0 : i32, i32
  }
  func.func @transform_2(%arg0: i32) -> (i32, i32) {
    %c0_i32 = arith.constant 0 : i32
    %c0_i32_0 = arith.constant 0 : i32
    %c0_i32_1 = arith.constant 0 : i32
    return %c0_i32, %c0_i32_0 : i32, i32
  }
  func.func @transform_3(%arg0: i32) -> (i32, i32) {
    %c0_i32 = arith.constant 0 : i32
    %c0_i32_0 = arith.constant 0 : i32
    return %arg0, %c0_i32 : i32, i32
  }
  func.func @transform_4(%arg0: i32) -> (i32, i32, i32) {
    %c0_i32 = arith.constant 0 : i32
    %c0_i32_0 = arith.constant 0 : i32
    %c0_i32_1 = arith.constant 0 : i32
    return %arg0, %c0_i32, %c0_i32_0 : i32, i32, i32
  }
}

</mosaic_0001>

<bundles_post_ra>
// kernel: vector_quantizer_forward.1
= control target key start
LH: loop header
LB: loop body
LE: loop exit
PB: predicated region body
PF: predicated region fallthrough
CT: control target
= control target key end

     0   :  { %vm52_vm0 = vcmask 261120   ;;  %s1891_s0 = inlined_call_operand.vmem [shape: f32[128,32], index: 0, kind: input, shape index: {}]   ;;  %s1892_s1 = inlined_call_operand.vmem [shape: f32[128,32], index: 1, kind: input, shape index: {}]   ;;  %s1893_s2 = inlined_call_operand.vmem [shape: f32[1,128], index: 2, kind: input, shape index: {}]   ;;  %s1894_s3 = inlined_call_operand.hbm [shape: f32[128,32], index: 3, kind: output, shape index: {0}]   ;;  %s1895_s4 = inlined_call_operand.vmem [shape: f32[1,1,32], index: 4, kind: output, shape index: {1}]  }
   0x1   :  { %v17_v0 = vld [vmem:[%s1892_s1] sm:$0xff]  ;;  %v18_v1 = vld [vmem:[%s1892_s1 + $0x8] sm:$0xff]  ;;  %v19_v2 = vld [vmem:[%s1892_s1 + $0x10] sm:$0xff] }
   0x2   :  { %v1177_v3 = vpack.c.bf16 %v18_v1, %v17_v0  ;;  %vm1325_vm1 = vmpackc.low %vm52_vm0, %vm52_vm0  ;;  %v20_v5 = vld [vmem:[%s1892_s1 + $0x18] sm:$0xff]  ;;  %v21_v7 = vld [vmem:[%s1892_s1 + $0x20] sm:$0xff] }
   0x3   :  { %v1183_v6 = vpack.c.bf16 %v20_v5, %v19_v2  ;;  %v22_v8 = vld [vmem:[%s1892_s1 + $0x28] sm:$0xff]  ;;  %v1347_v9 = vld [vmem:[%s1891_s0] sm:$0xff]  ;;  %v23_v11 = vld [vmem:[%s1892_s1 + $0x30] sm:$0xff] }
   0x4   :  { %1179 = vmatprep.subr.msk.bf16.mxu0 %vm1325_vm1, %v1177_v3  ;;  %1226 = vmatprep.subr.bf16.mxu1 %v1177_v3  ;;  %v1189_v10 = vpack.c.bf16 %v22_v8, %v21_v7  ;;  %v24_v12 = vld [vmem:[%s1892_s1 + $0x38] sm:$0xff] }
   0x5   :  { %1182 = vmatpush3.bf16.xpose.msk.msra.mxu0 %vm1325_vm1, %v1177_v3  ;;  %1228 = vmatpush3.bf16.msra.mxu1 %v1177_v3  ;;  %v1195_v13 = vpack.c.bf16 %v24_v12, %v23_v11 }
   0x6   :  { %1185 = vmatprep.subr.msk.bf16.mxu0 %vm1325_vm1, %v1183_v6  ;;  %1230 = vmatprep.subr.bf16.mxu1 %v1183_v6 }
   0x7   :  { %1097 = vmatprep.mubr.msk.f32.mxu0 %vm52_vm0, %v1347_v9 }
   0x9   :  { %1232 = vmatpush3.bf16.msra.mxu1 %v1183_v6 }
   0xa   :  { %1234 = vmatprep.subr.bf16.mxu1 %v1189_v10 }
   0xb   :  { %10 = vsyncpa [#allocation3], 0  ;;  %v25_v14 = vld [vmem:[%s1892_s1 + $0x40] sm:$0xff]  ;;  %v26_v15 = vld [vmem:[%s1892_s1 + $0x48] sm:$0xff] }
   0xc   :  { %v1201_v16 = vpack.c.bf16 %v26_v15, %v25_v14  ;;  %v27_v17 = vld [vmem:[%s1892_s1 + $0x50] sm:$0xff]  ;;  %v28_v18 = vld [vmem:[%s1892_s1 + $0x58] sm:$0xff]  ;;  %v29_v20 = vld [vmem:[%s1892_s1 + $0x60] sm:$0xff] }
   0xd   :  { %1188 = vmatpush3.bf16.xpose.msk.msra.mxu0 %vm1325_vm1, %v1183_v6  ;;  %1236 = vmatpush3.bf16.msra.mxu1 %v1189_v10  ;;  %v1207_v19 = vpack.c.bf16 %v28_v18, %v27_v17  ;;  %v30_v21 = vld [vmem:[%s1892_s1 + $0x68] sm:$0xff]  ;;  %v31_v23 = vld [vmem:[%s1892_s1 + $0x70] sm:$0xff]  ;;  %v32_v24 = vld [vmem:[%s1892_s1 + $0x78] sm:$0xff] }
   0xe   :  { %1191 = vmatprep.subr.msk.bf16.mxu0 %vm1325_vm1, %v1189_v10  ;;  %1238 = vmatprep.subr.bf16.mxu1 %v1195_v13  ;;  %v1213_v22 = vpack.c.bf16 %v30_v21, %v29_v20  ;;  %v1219_v25 = vpack.c.bf16 %v32_v24, %v31_v23  ;;  %v1410_v26 = vld [vmem:[%s1891_s0 + $0x8] sm:$0xff]  ;;  %v1415_v27 = vld [vmem:[%s1891_s0 + $0x10] sm:$0xff]  ;;  %v1424_v28 = vld [vmem:[%s1891_s0 + $0x18] sm:$0xff] }
   0xf   :  { %v1429_v29 = vld [vmem:[%s1891_s0 + $0x20] sm:$0xff]  ;;  %v1438_v30 = vld [vmem:[%s1891_s0 + $0x28] sm:$0xff]  ;;  %v1443_v31 = vld [vmem:[%s1891_s0 + $0x30] sm:$0xff] }
  0x10   :  { %v1452_v32 = vld [vmem:[%s1891_s0 + $0x38] sm:$0xff]  ;;  %v1457_v33 = vld [vmem:[%s1891_s0 + $0x40] sm:$0xff]  ;;  %v1466_v34 = vld [vmem:[%s1891_s0 + $0x48] sm:$0xff] }
  0x11   :  { %1240 = vmatpush3.bf16.msra.mxu1 %v1195_v13  ;;  %v1471_v35 = vld [vmem:[%s1891_s0 + $0x50] sm:$0xff]  ;;  %v1480_v36 = vld [vmem:[%s1891_s0 + $0x58] sm:$0xff]  ;;  %v1485_v37 = vld [vmem:[%s1891_s0 + $0x60] sm:$0xff] }
  0x12   :  { %1242 = vmatprep.subr.bf16.mxu1 %v1201_v16  ;;  %v1494_v38 = vld [vmem:[%s1891_s0 + $0x68] sm:$0xff]  ;;  %v1499_v39 = vld [vmem:[%s1891_s0 + $0x70] sm:$0xff]  ;;  %v1508_v40 = vld [vmem:[%s1891_s0 + $0x78] sm:$0xff]  ;;  %s1286_s0 = smov [#allocation2]  }
  0x13   :  { %v968_v43 = vld [vmem:[%s1893_s2] ss:$0 sm:$0xff]  ;;  %s921_s2 = sshll.u32 %s1286_s0, 4  ;;  %s1860_s2 = int_to_ptr.vmem [resolvable:$true] %s921_s2 }
  0x14   :  { %s1261_s27 = scalar_lea.vmem %s1860_s2, 2048  ;;  %p1266_p1 = scmp.lt.s32.totalorder %s1860_s2, %s1860_s2 }
  0x15   :  { %1194 = vmatpush3.bf16.xpose.msk.msra.mxu0 %vm1325_vm1, %v1189_v10  ;;  %1244 = vmatpush3.bf16.msra.mxu1 %v1201_v16  ;;  %p1262_p0 = scmp.ne.s32.totalorder %s1860_s2, %s1261_s27  ;;  %p1267_p2 = scmp.lt.s32.totalorder %s1261_s27, %s1261_s27 }
  0x16   :  { %1197 = vmatprep.subr.msk.bf16.mxu0 %vm1325_vm1, %v1195_v13  ;;  %1246 = vmatprep.subr.bf16.mxu1 %v1207_v19 }
  0x17   :  { %p1268_p3 = por %p1267_p2, %p1266_p1 }
  0x19   :  { %1248 = vmatpush3.bf16.msra.mxu1 %v1207_v19  ;;  %p1269_p4 = pnand %p1268_p3, %p1262_p0 }
  0x1a   :  { %1250 = vmatprep.subr.bf16.mxu1 %v1213_v22 }
  0x1d   :  { %1200 = vmatpush3.bf16.xpose.msk.msra.mxu0 %vm1325_vm1, %v1195_v13  ;;  %1252 = vmatpush3.bf16.msra.mxu1 %v1213_v22 }
  0x1e   :  { %1203 = vmatprep.subr.msk.bf16.mxu0 %vm1325_vm1, %v1201_v16  ;;  %1254 = vmatprep.subr.bf16.mxu1 %v1219_v25 }
  0x21   :  { %1256 = vmatpush3.bf16.msra.mxu1 %v1219_v25 }
  0x25   :  { %1206 = vmatpush3.bf16.xpose.msk.msra.mxu0 %vm1325_vm1, %v1201_v16 }
  0x26   :  { %1209 = vmatprep.subr.msk.bf16.mxu0 %vm1325_vm1, %v1207_v19 }
  0x2d   :  { %1212 = vmatpush3.bf16.xpose.msk.msra.mxu0 %vm1325_vm1, %v1207_v19 }
  0x2e   :  { %1215 = vmatprep.subr.msk.bf16.mxu0 %vm1325_vm1, %v1213_v22 }
  0x35   :  { %1218 = vmatpush3.bf16.xpose.msk.msra.mxu0 %vm1325_vm1, %v1213_v22 }
  0x36   :  { %1221 = vmatprep.subr.msk.bf16.mxu0 %vm1325_vm1, %v1219_v25 }
  0x3d   :  { %1224 = vmatpush3.bf16.xpose.msk.msra.mxu0 %vm1325_vm1, %v1219_v25 }
  0x44   :  { %1098 = vmatmul.mubr.msk.f32.vlgmr.msra.gmra.mrb[0].mxu0 %vm52_vm0, %v1410_v26 }
  0x45   :  { %1100 = vmatprep.mubr.msk.f32.mxu0 %vm52_vm0, %v1415_v27 }
  0x48   :  { %1101 = vmatmul.mubr.msk.f32.gmra.mrb[2].mxu0 %vm52_vm0, %v1424_v28 }
  0x49   :  { %1103 = vmatprep.mubr.msk.f32.mxu0 %vm52_vm0, %v1429_v29 }
  0x4c   :  { %1104 = vmatmul.mubr.msk.f32.gmra.mrb[4].mxu0 %vm52_vm0, %v1438_v30 }
  0x4d   :  { %1106 = vmatprep.mubr.msk.f32.mxu0 %vm52_vm0, %v1443_v31 }
  0x50   :  { %1107 = vmatmul.mubr.msk.f32.gmra.mrb[6].mxu0 %vm52_vm0, %v1452_v32 }
  0x51   :  { %1109 = vmatprep.mubr.msk.f32.mxu0 %vm52_vm0, %v1457_v33 }
  0x54   :  { %1110 = vmatmul.mubr.msk.f32.gmra.mrb[8].mxu0 %vm52_vm0, %v1466_v34 }
  0x55   :  { %1112 = vmatprep.mubr.msk.f32.mxu0 %vm52_vm0, %v1471_v35 }
  0x58   :  { %1113 = vmatmul.mubr.msk.f32.gmra.mrb[10].mxu0 %vm52_vm0, %v1480_v36 }
  0x59   :  { %1115 = vmatprep.mubr.msk.f32.mxu0 %vm52_vm0, %v1485_v37 }
  0x5c   :  { %1116 = vmatmul.mubr.msk.f32.gmra.mrb[12].mxu0 %vm52_vm0, %v1494_v38 }
  0x5d   :  { %1118 = vmatprep.mubr.msk.f32.mxu0 %vm52_vm0, %v1499_v39 }
  0x60   :  { %1119 = vmatmul.mubr.msk.f32.gmra.mrb[14].mxu0 %vm52_vm0, %v1508_v40 }
 0x117   :  { %v1099_v41 = vpop.f32.mrb[0].mxu0 }
 0x118   :  { %v215_v42 = vpop.f32.mrb[1].mxu0  ;;  %v295_v45 = vmul.f32 2.0, %v1099_v41 }
 0x119   :  { %v294_v44 = vmul.f32 2.0, %v215_v42  ;;  %v34_v42 = vlaneseq }
 0x11a   :  { %v1518_v52 = vsub.f32 %v968_v43, %v295_v45 }
 0x11b   :  { %v1102_v46 = vpop.f32.mrb[2].mxu0  ;;  %v1515_v47 = vsub.f32 %v968_v43, %v294_v44  ;;  %v1563_v44 = vand.u32 127, %v34_v42 }
 0x11c   :  { %v225_v48 = vpop.f32.mrb[3].mxu0  ;;  %v297_v50 = vmul.f32 2.0, %v1102_v46 }
 0x11d   :  { %v296_v49 = vmul.f32 2.0, %v225_v48  ;;  %332 = vmin.xlane.f32.xlu0 %v1515_v47 }
 0x11e   :  { %v1524_v58 = vsub.f32 %v968_v43, %v297_v50 }
 0x11f   :  { %v1105_v51 = vpop.f32.mrb[4].mxu0  ;;  %v1520_v53 = vsub.f32 %v968_v43, %v296_v49 }
 0x120   :  { %v235_v54 = vpop.f32.mrb[5].mxu0  ;;  %v299_v56 = vmul.f32 2.0, %v1105_v51 }
 0x121   :  { %v298_v55 = vmul.f32 2.0, %v235_v54  ;;  %334 = vmin.xlane.f32.xlu0 %v1518_v52  ;;  %336 = vmin.xlane.f32.xlu1 %v1520_v53 }
 0x122   :  { %v1530_v0 = vsub.f32 %v968_v43, %v299_v56 }
 0x123   :  { %v1108_v57 = vpop.f32.mrb[6].mxu0  ;;  %v1526_v59 = vsub.f32 %v968_v43, %v298_v55 }
 0x124   :  { %v245_v60 = vpop.f32.mrb[7].mxu0  ;;  %v301_v62 = vmul.f32 2.0, %v1108_v57 }
 0x125   :  { %v300_v61 = vmul.f32 2.0, %v245_v60  ;;  %338 = vmin.xlane.f32.xlu1 %v1524_v58  ;;  %340 = vmin.xlane.f32.xlu0 %v1526_v59 }
 0x126   :  { %v1536_v6 = vsub.f32 %v968_v43, %v301_v62 }
 0x127   :  { %v1111_v63 = vpop.f32.mrb[8].mxu0  ;;  %v1532_v1 = vsub.f32 %v968_v43, %v300_v61 }
 0x128   :  { %v255_v2 = vpop.f32.mrb[9].mxu0  ;;  %v303_v4 = vmul.f32 2.0, %v1111_v63 }
 0x129   :  { %v302_v3 = vmul.f32 2.0, %v255_v2  ;;  %342 = vmin.xlane.f32.xlu1 %v1530_v0  ;;  %344 = vmin.xlane.f32.xlu0 %v1532_v1 }
 0x12a   :  { %v1542_v13 = vsub.f32 %v968_v43, %v303_v4 }
 0x12b   :  { %v1114_v5 = vpop.f32.mrb[10].mxu0  ;;  %v1538_v7 = vsub.f32 %v968_v43, %v302_v3 }
 0x12c   :  { %v265_v8 = vpop.f32.mrb[11].mxu0  ;;  %v305_v11 = vmul.f32 2.0, %v1114_v5 }
 0x12d   :  { %v304_v10 = vmul.f32 2.0, %v265_v8  ;;  %346 = vmin.xlane.f32.xlu1 %v1536_v6  ;;  %348 = vmin.xlane.f32.xlu0 %v1538_v7 }
 0x12e   :  { %v1548_v19 = vsub.f32 %v968_v43, %v305_v11 }
 0x12f   :  { %v1117_v12 = vpop.f32.mrb[12].mxu0  ;;  %v1544_v14 = vsub.f32 %v968_v43, %v304_v10 }
 0x130   :  { %v275_v15 = vpop.f32.mrb[13].mxu0  ;;  %v307_v17 = vmul.f32 2.0, %v1117_v12 }
 0x131   :  { %v306_v16 = vmul.f32 2.0, %v275_v15  ;;  %350 = vmin.xlane.f32.xlu1 %v1542_v13  ;;  %352 = vmin.xlane.f32.xlu0 %v1544_v14 }
 0x132   :  { %v1554_v24 = vsub.f32 %v968_v43, %v307_v17 }
 0x133   :  { %v1120_v18 = vpop.f32.mrb[14].mxu0  ;;  %v1550_v20 = vsub.f32 %v968_v43, %v306_v16 }
 0x134   :  { %v285_v21 = vpop.f32.mrb[15].mxu0  ;;  %v309_v23 = vmul.f32 2.0, %v1120_v18 }
 0x135   :  { %v308_v22 = vmul.f32 2.0, %v285_v21  ;;  %354 = vmin.xlane.f32.xlu1 %v1548_v19  ;;  %356 = vmin.xlane.f32.xlu0 %v1550_v20 }
 0x136   :  { %v1560_v41 = vsub.f32 %v968_v43, %v309_v23 }
 0x137   :  { %v1556_v25 = vsub.f32 %v968_v43, %v308_v22 }
 0x139   :  { %358 = vmin.xlane.f32.xlu1 %v1554_v24  ;;  %360 = vmin.xlane.f32.xlu0 %v1556_v25 }
 0x13d   :  { %362 = vmin.xlane.f32.xlu1 %v1560_v41 }
 0x1aa   :  { %v333_v45 = vpop.xlane.xlu0 %332 }
 0x1ab   :  { %vm364_vm2 = vcmp.eq.f32.partialorder %v1515_v47, %v333_v45 }
 0x1ac   :  { %v1567_v46 = vsel %vm364_vm2, %v1563_v44, 128 }
 0x1ad   :  { %v397_v48 = vshra.s32 %v1567_v46, 16 }
 0x1ae   :  { %v335_v49 = vpop.xlane.xlu0 %334  ;;  %v337_v50 = vpop.xlane.xlu1 %336 }
 0x1af   :  { %vm365_vm3 = vcmp.eq.f32.partialorder %v1518_v52, %v335_v49  ;;  %vm366_vm4 = vcmp.eq.f32.partialorder %v1520_v53, %v337_v50  ;;  %v1572_v43 = vcvt.s32.f32 %v397_v48 }
 0x1b0   :  { %v1575_v51 = vsel %vm365_vm3, %v1563_v44, 128  ;;  %v1578_v54 = vsel %vm366_vm4, %v1563_v44, 128 }
 0x1b1   :  { %400 = vmin.xlane.f32.xlu0 %v1572_v43  ;;  %v411_v47 = vshra.s32 %v1575_v51, 16  ;;  %v425_v55 = vshra.s32 %v1578_v54, 16 }
 0x1b2   :  { %v339_v56 = vpop.xlane.xlu1 %338  ;;  %v341_v57 = vpop.xlane.xlu0 %340 }
 0x1b3   :  { %vm367_vm5 = vcmp.eq.f32.partialorder %v1524_v58, %v339_v56  ;;  %vm368_vm6 = vcmp.eq.f32.partialorder %v1526_v59, %v341_v57  ;;  %v1585_v52 = vcvt.s32.f32 %v411_v47  ;;  %v1587_v53 = vcvt.s32.f32 %v425_v55 }
 0x1b4   :  { %v1590_v60 = vsel %vm367_vm5, %v1563_v44, 128  ;;  %v1593_v61 = vsel %vm368_vm6, %v1563_v44, 128 }
 0x1b5   :  { %414 = vmin.xlane.f32.xlu1 %v1585_v52  ;;  %428 = vmin.xlane.f32.xlu0 %v1587_v53  ;;  %v439_v62 = vshra.s32 %v1590_v60, 16  ;;  %v453_v58 = vshra.s32 %v1593_v61, 16 }
 0x1b6   :  { %v343_v63 = vpop.xlane.xlu1 %342  ;;  %v345_v59 = vpop.xlane.xlu0 %344 }
 0x1b7   :  { %vm369_vm7 = vcmp.eq.f32.partialorder %v1530_v0, %v343_v63  ;;  %vm370_vm8 = vcmp.eq.f32.partialorder %v1532_v1, %v345_v59  ;;  %v1601_v2 = vcvt.s32.f32 %v439_v62  ;;  %v1603_v3 = vcvt.s32.f32 %v453_v58 }
 0x1b8   :  { %v1606_v4 = vsel %vm369_vm7, %v1563_v44, 128  ;;  %v1609_v5 = vsel %vm370_vm8, %v1563_v44, 128 }
 0x1b9   :  { %442 = vmin.xlane.f32.xlu1 %v1601_v2  ;;  %456 = vmin.xlane.f32.xlu0 %v1603_v3  ;;  %v467_v8 = vshra.s32 %v1606_v4, 16  ;;  %v481_v0 = vshra.s32 %v1609_v5, 16 }
 0x1ba   :  { %v347_v10 = vpop.xlane.xlu1 %346  ;;  %v349_v1 = vpop.xlane.xlu0 %348 }
 0x1bb   :  { %vm371_vm9 = vcmp.eq.f32.partialorder %v1536_v6, %v347_v10  ;;  %vm372_vm10 = vcmp.eq.f32.partialorder %v1538_v7, %v349_v1  ;;  %v1617_v11 = vcvt.s32.f32 %v467_v8  ;;  %v1619_v12 = vcvt.s32.f32 %v481_v0 }
 0x1bc   :  { %v1622_v15 = vsel %vm371_vm9, %v1563_v44, 128  ;;  %v1625_v16 = vsel %vm372_vm10, %v1563_v44, 128 }
 0x1bd   :  { %470 = vmin.xlane.f32.xlu1 %v1617_v11  ;;  %484 = vmin.xlane.f32.xlu0 %v1619_v12  ;;  %v495_v17 = vshra.s32 %v1622_v15, 16  ;;  %v509_v6 = vshra.s32 %v1625_v16, 16 }
 0x1be   :  { %v351_v18 = vpop.xlane.xlu1 %350  ;;  %v353_v7 = vpop.xlane.xlu0 %352 }
 0x1bf   :  { %vm373_vm11 = vcmp.eq.f32.partialorder %v1542_v13, %v351_v18  ;;  %vm374_vm12 = vcmp.eq.f32.partialorder %v1544_v14, %v353_v7  ;;  %v1633_v21 = vcvt.s32.f32 %v495_v17  ;;  %v1635_v22 = vcvt.s32.f32 %v509_v6 }
 0x1c0   :  { %v1638_v23 = vsel %vm373_vm11, %v1563_v44, 128  ;;  %v1641_v42 = vsel %vm374_vm12, %v1563_v44, 128  ;;  %v396_v18 = vand.u32 65535, %v1567_v46  ;;  %v424_v7 = vand.u32 65535, %v1578_v54 }
 0x1c1   :  { %498 = vmin.xlane.f32.xlu1 %v1633_v21  ;;  %512 = vmin.xlane.f32.xlu0 %v1635_v22  ;;  %v523_v45 = vshra.s32 %v1638_v23, 16  ;;  %v537_v13 = vshra.s32 %v1641_v42, 16 }
 0x1c2   :  { %v355_v48 = vpop.xlane.xlu1 %354  ;;  %v357_v14 = vpop.xlane.xlu0 %356 }
 0x1c3   :  { %vm375_vm13 = vcmp.eq.f32.partialorder %v1548_v19, %v355_v48  ;;  %vm376_vm14 = vcmp.eq.f32.partialorder %v1550_v20, %v357_v14  ;;  %v1649_v49 = vcvt.s32.f32 %v523_v45  ;;  %v1651_v50 = vcvt.s32.f32 %v537_v13 }
 0x1c4   :  { %v1654_v47 = vsel %vm375_vm13, %v1563_v44, 128  ;;  %v1657_v55 = vsel %vm376_vm14, %v1563_v44, 128  ;;  %v398_v13 = vcvt.s32.f32 %v396_v18  ;;  %v438_v14 = vand.u32 65535, %v1590_v60 }
 0x1c5   :  { %526 = vmin.xlane.f32.xlu1 %v1649_v49  ;;  %540 = vmin.xlane.f32.xlu0 %v1651_v50  ;;  %v551_v56 = vshra.s32 %v1654_v47, 16  ;;  %v565_v19 = vshra.s32 %v1657_v55, 16  ;;  %v466_v60 = vand.u32 65535, %v1606_v4  ;;  %v494_v4 = vand.u32 65535, %v1622_v15 }
 0x1c6   :  { %v359_v57 = vpop.xlane.xlu1 %358  ;;  %v361_v20 = vpop.xlane.xlu0 %360  ;;  %v522_v15 = vand.u32 65535, %v1638_v23  ;;  %v550_v23 = vand.u32 65535, %v1654_v47 }
 0x1c7   :  { %vm377_vm15 = vcmp.eq.f32.partialorder %v1554_v24, %v359_v57  ;;  %vm378_vm1 = vcmp.eq.f32.partialorder %v1556_v25, %v361_v20  ;;  %v1665_v62 = vcvt.s32.f32 %v551_v56  ;;  %v1667_v58 = vcvt.s32.f32 %v565_v19 }
 0x1c8   :  { %v1670_v63 = vsel %vm377_vm15, %v1563_v44, 128  ;;  %v1673_v59 = vsel %vm378_vm1, %v1563_v44, 128  ;;  %v452_v56 = vand.u32 65535, %v1593_v61  ;;  %v480_v61 = vand.u32 65535, %v1609_v5 }
 0x1c9   :  { %554 = vmin.xlane.f32.xlu1 %v1665_v62  ;;  %568 = vmin.xlane.f32.xlu0 %v1667_v58  ;;  %v579_v8 = vshra.s32 %v1670_v63, 16  ;;  %v593_v24 = vshra.s32 %v1673_v59, 16  ;;  %v508_v5 = vand.u32 65535, %v1625_v16  ;;  %v536_v16 = vand.u32 65535, %v1641_v42 }
 0x1ca   :  { %v363_v0 = vpop.xlane.xlu1 %362  ;;  %v564_v42 = vand.u32 65535, %v1657_v55  ;;  %v578_v47 = vand.u32 65535, %v1670_v63  ;;  %v592_v55 = vand.u32 65535, %v1673_v59 }
 0x1cb   :  { %vm379_vm2 = vcmp.eq.f32.partialorder %v1560_v41, %v363_v0  ;;  %v1680_v25 = vcvt.s32.f32 %v579_v8  ;;  %v1682_v10 = vcvt.s32.f32 %v593_v24  ;;  %v410_v41 = vand.u32 65535, %v1575_v51 }
 0x1cc   :  { %v1685_v1 = vsel %vm379_vm2, %v1563_v44, 128  ;;  %v426_v51 = vcvt.s32.f32 %v424_v7  ;;  %v440_v24 = vcvt.s32.f32 %v438_v14  ;;  %v454_v0 = vcvt.s32.f32 %v452_v56 }
 0x1cd   :  { %582 = vmin.xlane.f32.xlu1 %v1680_v25  ;;  %596 = vmin.xlane.f32.xlu0 %v1682_v10  ;;  %v607_v17 = vshra.s32 %v1685_v1, 16  ;;  %v412_v46 = vcvt.s32.f32 %v410_v41  ;;  %v468_v41 = vcvt.s32.f32 %v466_v60  ;;  %v482_v7 = vcvt.s32.f32 %v480_v61 }
 0x1ce   :  { %v496_v14 = vcvt.s32.f32 %v494_v4  ;;  %v510_v56 = vcvt.s32.f32 %v508_v5  ;;  %v606_v63 = vand.u32 65535, %v1685_v1  ;;  %v594_v4 = vcvt.s32.f32 %v592_v55 }
 0x1cf   :  { %v1690_v6 = vcvt.s32.f32 %v607_v17 }
 0x1d1   :  { %610 = vmin.xlane.f32.xlu1 %v1690_v6 }
 0x23e   :  { %v1696_v45 = vpop.xlane.xlu0 %400 }
 0x23f   :  { %vm402_vm3 = vcmp.eq.f32.partialorder %v1572_v43, %v1696_v45 }
 0x240   :  { %v403_v48 = vsel %vm402_vm3, %v398_v13, inf }
 0x241   :  { %404 = vmin.xlane.f32.xlu0 %v403_v48 }
 0x242   :  { %v1702_v19 = vpop.xlane.xlu1 %414  ;;  %v1704_v57 = vpop.xlane.xlu0 %428 }
 0x243   :  { %vm416_vm4 = vcmp.eq.f32.partialorder %v1585_v52, %v1702_v19  ;;  %vm430_vm5 = vcmp.eq.f32.partialorder %v1587_v53, %v1704_v57 }
 0x244   :  { %v417_v54 = vsel %vm416_vm4, %v412_v46, inf  ;;  %v431_v43 = vsel %vm430_vm5, %v426_v51, inf }
 0x245   :  { %418 = vmin.xlane.f32.xlu1 %v417_v54  ;;  %432 = vmin.xlane.f32.xlu0 %v431_v43  ;;  %v524_v54 = vcvt.s32.f32 %v522_v15  ;;  %v538_v43 = vcvt.s32.f32 %v536_v16 }
 0x246   :  { %v1712_v20 = vpop.xlane.xlu1 %442  ;;  %v1714_v8 = vpop.xlane.xlu0 %456 }
 0x247   :  { %vm444_vm6 = vcmp.eq.f32.partialorder %v1601_v2, %v1712_v20  ;;  %vm458_vm7 = vcmp.eq.f32.partialorder %v1603_v3, %v1714_v8 }
 0x248   :  { %v445_v52 = vsel %vm444_vm6, %v440_v24, inf  ;;  %v459_v53 = vsel %vm458_vm7, %v454_v0, inf  ;;  %v552_v24 = vcvt.s32.f32 %v550_v23  ;;  %v566_v0 = vcvt.s32.f32 %v564_v42 }
 0x249   :  { %446 = vmin.xlane.f32.xlu1 %v445_v52  ;;  %460 = vmin.xlane.f32.xlu0 %v459_v53  ;;  %v580_v53 = vcvt.s32.f32 %v578_v47 }
 0x24a   :  { %v1722_v17 = vpop.xlane.xlu1 %470  ;;  %v1724_v18 = vpop.xlane.xlu0 %484 }
 0x24b   :  { %vm472_vm8 = vcmp.eq.f32.partialorder %v1617_v11, %v1722_v17  ;;  %vm486_vm9 = vcmp.eq.f32.partialorder %v1619_v12, %v1724_v18 }
 0x24c   :  { %v473_v2 = vsel %vm472_vm8, %v468_v41, inf  ;;  %v487_v3 = vsel %vm486_vm9, %v482_v7, inf  ;;  %v608_v41 = vcvt.s32.f32 %v606_v63  ;;  %v407_v7 = vcvt.f32.s32 %v1696_v45 }
 0x24d   :  { %474 = vmin.xlane.f32.xlu1 %v473_v2  ;;  %488 = vmin.xlane.f32.xlu0 %v487_v3  ;;  %v421_v2 = vcvt.f32.s32 %v1702_v19  ;;  %v1285_v45 = vmov 1.0  }
 0x24e   :  { %v1732_v13 = vpop.xlane.xlu1 %498  ;;  %v1734_v48 = vpop.xlane.xlu0 %512  ;;  %v408_v3 = vshll.u32 %v407_v7, 16 }
 0x24f   :  { %vm500_vm10 = vcmp.eq.f32.partialorder %v1633_v21, %v1732_v13  ;;  %vm514_vm11 = vcmp.eq.f32.partialorder %v1635_v22, %v1734_v48 }
 0x250   :  { %v501_v11 = vsel %vm500_vm10, %v496_v14, inf  ;;  %v515_v12 = vsel %vm514_vm11, %v510_v56, inf  ;;  %v422_v14 = vshll.u32 %v421_v2, 16  ;;  %v449_v56 = vcvt.f32.s32 %v1712_v20 }
 0x251   :  { %502 = vmin.xlane.f32.xlu1 %v501_v11  ;;  %516 = vmin.xlane.f32.xlu0 %v515_v12  ;;  %v463_v11 = vcvt.f32.s32 %v1714_v8  ;;  %v491_v20 = vcvt.f32.s32 %v1724_v18  ;;  %v519_v18 = vcvt.f32.s32 %v1734_v48 }
 0x252   :  { %v1742_v46 = vpop.xlane.xlu1 %526  ;;  %v1744_v51 = vpop.xlane.xlu0 %540 }
 0x253   :  { %vm528_vm12 = vcmp.eq.f32.partialorder %v1649_v49, %v1742_v46  ;;  %vm542_vm13 = vcmp.eq.f32.partialorder %v1651_v50, %v1744_v51  ;;  %v492_v63 = vshll.u32 %v491_v20, 16  ;;  %v520_v2 = vshll.u32 %v519_v18, 16 }
 0x254   :  { %v529_v21 = vsel %vm528_vm12, %v524_v54, inf  ;;  %v543_v22 = vsel %vm542_vm13, %v538_v43, inf  ;;  %v547_v48 = vcvt.f32.s32 %v1744_v51 }
 0x255   :  { %530 = vmin.xlane.f32.xlu1 %v529_v21  ;;  %544 = vmin.xlane.f32.xlu0 %v543_v22  ;;  %v464_v21 = vshll.u32 %v463_v11, 16  ;;  %v477_v22 = vcvt.f32.s32 %v1722_v17  ;;  %v505_v17 = vcvt.f32.s32 %v1732_v13  ;;  %v533_v13 = vcvt.f32.s32 %v1742_v46 }
 0x256   :  { %v1752_v60 = vpop.xlane.xlu1 %554  ;;  %v1754_v61 = vpop.xlane.xlu0 %568  ;;  %v548_v11 = vshll.u32 %v547_v48, 16 }
 0x257   :  { %vm556_vm14 = vcmp.eq.f32.partialorder %v1665_v62, %v1752_v60  ;;  %vm570_vm15 = vcmp.eq.f32.partialorder %v1667_v58, %v1754_v61  ;;  %v506_v7 = vshll.u32 %v505_v17, 16  ;;  %v561_v46 = vcvt.f32.s32 %v1752_v60 }
 0x258   :  { %v557_v49 = vsel %vm556_vm14, %v552_v24, inf  ;;  %v571_v50 = vsel %vm570_vm15, %v566_v0, inf  ;;  %v575_v51 = vcvt.f32.s32 %v1754_v61 }
 0x259   :  { %558 = vmin.xlane.f32.xlu1 %v557_v49  ;;  %572 = vmin.xlane.f32.xlu0 %v571_v50  ;;  %v478_v50 = vshll.u32 %v477_v22, 16 }
 0x25a   :  { %v1761_v52 = vpop.xlane.xlu1 %582  ;;  %v1763_v59 = vpop.xlane.xlu0 %596 }
 0x25b   :  { %vm584_vm1 = vcmp.eq.f32.partialorder %v1680_v25, %v1761_v52  ;;  %vm598_vm2 = vcmp.eq.f32.partialorder %v1682_v10, %v1763_v59  ;;  %v435_v10 = vcvt.f32.s32 %v1704_v57  ;;  %v450_v57 = vshll.u32 %v449_v56, 16 }
 0x25c   :  { %v585_v62 = vsel %vm584_vm1, %v580_v53, inf  ;;  %v599_v58 = vsel %vm598_vm2, %v594_v4, inf  ;;  %v534_v56 = vshll.u32 %v533_v13, 16  ;;  %v589_v60 = vcvt.f32.s32 %v1761_v52 }
 0x25d   :  { %586 = vmin.xlane.f32.xlu1 %v585_v62  ;;  %600 = vmin.xlane.f32.xlu0 %v599_v58  ;;  %v603_v61 = vcvt.f32.s32 %v1763_v59 }
 0x25e   :  { %v1769_v5 = vpop.xlane.xlu1 %610 }
 0x25f   :  { %vm612_vm3 = vcmp.eq.f32.partialorder %v1690_v6, %v1769_v5  ;;  %v436_v6 = vshll.u32 %v435_v10, 16  ;;  %v617_v52 = vcvt.f32.s32 %v1769_v5 }
 0x260   :  { %v613_v1 = vsel %vm612_vm3, %v608_v41, inf }
 0x261   :  { %614 = vmin.xlane.f32.xlu1 %v613_v1 }
 0x2ce   :  { %v405_v25 = vpop.xlane.xlu0 %404 }
 0x2cf   :  { %v406_v15 = vcvt.f32.s32 %v405_v25 }
 0x2d1   :  { %v409_v16 = vadd.s32 %v408_v3, %v406_v15 }
 0x2d2   :  { %v419_v12 = vpop.xlane.xlu1 %418  ;;  %v433_v23 = vpop.xlane.xlu0 %432 }
 0x2d3   :  { %v420_v42 = vcvt.f32.s32 %v419_v12  ;;  %v434_v54 = vcvt.f32.s32 %v433_v23  ;;  %vm620_vm4 = vcmp.eq.s32.totalorder %v1563_v44, %v409_v16 }
 0x2d4   :  { %1153 = vmatprep.mubr.msk.f32.mxu1 %vm620_vm4, %v1285_v45 }
 0x2d5   :  { %v423_v19 = vadd.s32 %v422_v14, %v420_v42  ;;  %v437_v43 = vadd.s32 %v436_v6, %v434_v54 }
 0x2d6   :  { %v447_v47 = vpop.xlane.xlu1 %446  ;;  %v461_v8 = vpop.xlane.xlu0 %460 }
 0x2d7   :  { %v448_v55 = vcvt.f32.s32 %v447_v47  ;;  %v462_v24 = vcvt.f32.s32 %v461_v8  ;;  %vm621_vm5 = vcmp.eq.s32.totalorder %v1563_v44, %v423_v19  ;;  %vm622_vm6 = vcmp.eq.s32.totalorder %v1563_v44, %v437_v43 }
 0x2d8   :  { %1154 = vmatmul.mubr.msk.f32.vlgmr.msra.gmra.mrb[0].mxu1 %vm621_vm5, %v1285_v45  ;;  %v562_v43 = vshll.u32 %v561_v46, 16 }
 0x2d9   :  { %v451_v0 = vadd.s32 %v450_v57, %v448_v55  ;;  %v465_v49 = vadd.s32 %v464_v21, %v462_v24  ;;  %1156 = vmatprep.mubr.msk.f32.mxu1 %vm622_vm6, %v1285_v45  ;;  %v576_v57 = vshll.u32 %v575_v51, 16  ;;  %v590_v24 = vshll.u32 %v589_v60, 16 }
 0x2da   :  { %v475_v53 = vpop.xlane.xlu1 %474  ;;  %v489_v4 = vpop.xlane.xlu0 %488 }
 0x2db   :  { %v476_v62 = vcvt.f32.s32 %v475_v53  ;;  %v490_v58 = vcvt.f32.s32 %v489_v4  ;;  %vm623_vm7 = vcmp.eq.s32.totalorder %v1563_v44, %v451_v0  ;;  %vm624_vm8 = vcmp.eq.s32.totalorder %v1563_v44, %v465_v49 }
 0x2dc   :  { %1157 = vmatmul.mubr.msk.f32.gmra.mrb[2].mxu1 %vm623_vm7, %v1285_v45  ;;  %v604_v0 = vshll.u32 %v603_v61, 16  ;;  %v618_v4 = vshll.u32 %v617_v52, 16 }
 0x2dd   :  { %v479_v41 = vadd.s32 %v478_v50, %v476_v62  ;;  %v493_v1 = vadd.s32 %v492_v63, %v490_v58  ;;  %1159 = vmatprep.mubr.msk.f32.mxu1 %vm624_vm8, %v1285_v45 }
 0x2de   :  { %v503_v25 = vpop.xlane.xlu1 %502  ;;  %v517_v3 = vpop.xlane.xlu0 %516 }
 0x2df   :  { %v504_v10 = vcvt.f32.s32 %v503_v25  ;;  %v518_v15 = vcvt.f32.s32 %v517_v3  ;;  %vm625_vm9 = vcmp.eq.s32.totalorder %v1563_v44, %v479_v41  ;;  %vm626_vm10 = vcmp.eq.s32.totalorder %v1563_v44, %v493_v1 }
 0x2e0   :  { %1160 = vmatmul.mubr.msk.f32.gmra.mrb[4].mxu1 %vm625_vm9, %v1285_v45 }
 0x2e1   :  { %v507_v16 = vadd.s32 %v506_v7, %v504_v10  ;;  %v521_v14 = vadd.s32 %v520_v2, %v518_v15  ;;  %1162 = vmatprep.mubr.msk.f32.mxu1 %vm626_vm10, %v1285_v45 }
 0x2e2   :  { %v531_v12 = vpop.xlane.xlu1 %530  ;;  %v545_v23 = vpop.xlane.xlu0 %544 }
 0x2e3   :  { %v532_v6 = vcvt.f32.s32 %v531_v12  ;;  %v546_v42 = vcvt.f32.s32 %v545_v23  ;;  %vm627_vm11 = vcmp.eq.s32.totalorder %v1563_v44, %v507_v16  ;;  %vm628_vm12 = vcmp.eq.s32.totalorder %v1563_v44, %v521_v14 }
 0x2e4   :  { %1163 = vmatmul.mubr.msk.f32.gmra.mrb[6].mxu1 %vm627_vm11, %v1285_v45 }
 0x2e5   :  { %v535_v54 = vadd.s32 %v534_v56, %v532_v6  ;;  %v549_v19 = vadd.s32 %v548_v11, %v546_v42  ;;  %1165 = vmatprep.mubr.msk.f32.mxu1 %vm628_vm12, %v1285_v45 }
 0x2e6   :  { %v559_v21 = vpop.xlane.xlu1 %558  ;;  %v573_v22 = vpop.xlane.xlu0 %572 }
 0x2e7   :  { %v560_v20 = vcvt.f32.s32 %v559_v21  ;;  %v574_v47 = vcvt.f32.s32 %v573_v22  ;;  %vm629_vm13 = vcmp.eq.s32.totalorder %v1563_v44, %v535_v54  ;;  %vm630_vm14 = vcmp.eq.s32.totalorder %v1563_v44, %v549_v19 }
 0x2e8   :  { %1166 = vmatmul.mubr.msk.f32.gmra.mrb[8].mxu1 %vm629_vm13, %v1285_v45 }
 0x2e9   :  { %v563_v8 = vadd.s32 %v562_v43, %v560_v20  ;;  %v577_v55 = vadd.s32 %v576_v57, %v574_v47  ;;  %1168 = vmatprep.mubr.msk.f32.mxu1 %vm630_vm14, %v1285_v45 }
 0x2ea   :  { %v587_v49 = vpop.xlane.xlu1 %586  ;;  %v601_v59 = vpop.xlane.xlu0 %600 }
 0x2eb   :  { %v588_v50 = vcvt.f32.s32 %v587_v49  ;;  %v602_v63 = vcvt.f32.s32 %v601_v59  ;;  %vm631_vm15 = vcmp.eq.s32.totalorder %v1563_v44, %v563_v8  ;;  %vm632_vm1 = vcmp.eq.s32.totalorder %v1563_v44, %v577_v55 }
 0x2ec   :  { %1169 = vmatmul.mubr.msk.f32.gmra.mrb[10].mxu1 %vm631_vm15, %v1285_v45 }
 0x2ed   :  { %v591_v17 = vadd.s32 %v590_v24, %v588_v50  ;;  %v605_v18 = vadd.s32 %v604_v0, %v602_v63  ;;  %1171 = vmatprep.mubr.msk.f32.mxu1 %vm632_vm1, %v1285_v45 }
 0x2ee   :  { %v615_v53 = vpop.xlane.xlu1 %614 }
 0x2ef   :  { %v616_v62 = vcvt.f32.s32 %v615_v53  ;;  %vm633_vm2 = vcmp.eq.s32.totalorder %v1563_v44, %v591_v17  ;;  %vm634_vm3 = vcmp.eq.s32.totalorder %v1563_v44, %v605_v18 }
 0x2f0   :  { %1172 = vmatmul.mubr.msk.f32.gmra.mrb[12].mxu1 %vm633_vm2, %v1285_v45 }
 0x2f1   :  { %v619_v5 = vadd.s32 %v618_v4, %v616_v62  ;;  %1174 = vmatprep.mubr.msk.f32.mxu1 %vm634_vm3, %v1285_v45 }
 0x2f3   :  { %vm635_vm4 = vcmp.eq.s32.totalorder %v1563_v44, %v619_v5 }
 0x2f4   :  { %1175 = vmatmul.mubr.msk.f32.gmra.mrb[14].mxu1 %vm635_vm4, %v1285_v45 }
 0x3ab   :  { %v1155_v58 = vpop.f32.mrb[0].mxu1 }
 0x3ac   :  { %814 = vst.msk [vmem:[#allocation2 + $0x8] sm:$0xff] %vm52_vm0, %v1155_v58  ;;  %v830_v41 = vsub.f32 %v1155_v58, %v1410_v26  ;;  %v734_v1 = vpop.f32.mrb[1].mxu1 }
 0x3ad   :  { %813 = vst.msk [vmem:[#allocation2] sm:$0xff] %vm52_vm0, %v734_v1  ;;  %v829_v7 = vsub.f32 %v734_v1, %v1347_v9 }
 0x3ae   :  { %v846_v2 = vmul.f32 %v830_v41, %v830_v41 }
 0x3af   :  { %v845_v13 = vmul.f32 %v829_v7, %v829_v7  ;;  %v1158_v48 = vpop.f32.mrb[2].mxu1 }
 0x3b0   :  { %v878_v25 = vsel %vm52_vm0, %v846_v2, 0.0  ;;  %816 = vst.msk [vmem:[#allocation2 + $0x18] sm:$0xff] %vm52_vm0, %v1158_v48  ;;  %v832_v44 = vsub.f32 %v1158_v48, %v1424_v28  ;;  %v744_v45 = vpop.f32.mrb[3].mxu1 }
 0x3b1   :  { %v877_v3 = vsel %vm52_vm0, %v845_v13, 0.0  ;;  %815 = vst.msk [vmem:[#allocation2 + $0x10] sm:$0xff] %vm52_vm0, %v744_v45  ;;  %v831_v26 = vsub.f32 %v744_v45, %v1415_v27 }
 0x3b2   :  { %v879_v10 = vadd.f32 %v878_v25, %v877_v3  ;;  %v848_v15 = vmul.f32 %v832_v44, %v832_v44 }
 0x3b3   :  { %v847_v16 = vmul.f32 %v831_v26, %v831_v26  ;;  %v1161_v9 = vpop.f32.mrb[4].mxu1 }
 0x3b4   :  { %818 = vst.msk [vmem:[#allocation2 + $0x28] sm:$0xff] %vm52_vm0, %v1161_v9  ;;  %v834_v14 = vsub.f32 %v1161_v9, %v1438_v30  ;;  %v754_v56 = vpop.f32.mrb[5].mxu1  ;;  %v882_v51 = vsel %vm52_vm0, %v848_v15, 0.0 }
 0x3b5   :  { %v880_v11 = vsel %vm52_vm0, %v847_v16, 0.0  ;;  %817 = vst.msk [vmem:[#allocation2 + $0x20] sm:$0xff] %vm52_vm0, %v754_v56  ;;  %v833_v28 = vsub.f32 %v754_v56, %v1429_v29 }
 0x3b6   :  { %v881_v46 = vadd.f32 %v880_v11, %v879_v10  ;;  %v850_v12 = vmul.f32 %v834_v14, %v834_v14 }
 0x3b7   :  { %v849_v27 = vmul.f32 %v833_v28, %v833_v28  ;;  %v1164_v23 = vpop.f32.mrb[6].mxu1 }
 0x3b8   :  { %v883_v6 = vadd.f32 %v882_v51, %v881_v46  ;;  %820 = vst.msk [vmem:[#allocation2 + $0x38] sm:$0xff] %vm52_vm0, %v1164_v23  ;;  %v836_v42 = vsub.f32 %v1164_v23, %v1452_v32  ;;  %v764_v54 = vpop.f32.mrb[7].mxu1  ;;  %v886_v29 = vsel %vm52_vm0, %v850_v12, 0.0 }
 0x3b9   :  { %v884_v30 = vsel %vm52_vm0, %v849_v27, 0.0  ;;  %819 = vst.msk [vmem:[#allocation2 + $0x30] sm:$0xff] %vm52_vm0, %v764_v54  ;;  %v835_v19 = vsub.f32 %v764_v54, %v1443_v31 }
 0x3ba   :  { %v885_v43 = vadd.f32 %v884_v30, %v883_v6  ;;  %v852_v57 = vmul.f32 %v836_v42, %v836_v42 }
 0x3bb   :  { %v851_v60 = vmul.f32 %v835_v19, %v835_v19  ;;  %v1167_v61 = vpop.f32.mrb[8].mxu1 }
 0x3bc   :  { %v887_v21 = vadd.f32 %v886_v29, %v885_v43  ;;  %822 = vst.msk [vmem:[#allocation2 + $0x48] sm:$0xff] %vm52_vm0, %v1167_v61  ;;  %v838_v22 = vsub.f32 %v1167_v61, %v1466_v34  ;;  %v774_v20 = vpop.f32.mrb[9].mxu1  ;;  %v890_v31 = vsel %vm52_vm0, %v852_v57, 0.0 }
 0x3bd   :  { %v888_v32 = vsel %vm52_vm0, %v851_v60, 0.0  ;;  %821 = vst.msk [vmem:[#allocation2 + $0x40] sm:$0xff] %vm52_vm0, %v774_v20  ;;  %v837_v47 = vsub.f32 %v774_v20, %v1457_v33 }
 0x3be   :  { %v889_v8 = vadd.f32 %v888_v32, %v887_v21  ;;  %v854_v55 = vmul.f32 %v838_v22, %v838_v22 }
 0x3bf   :  { %v853_v24 = vmul.f32 %v837_v47, %v837_v47  ;;  %v1170_v0 = vpop.f32.mrb[10].mxu1 }
 0x3c0   :  { %v891_v52 = vadd.f32 %v890_v31, %v889_v8  ;;  %824 = vst.msk [vmem:[#allocation2 + $0x58] sm:$0xff] %vm52_vm0, %v1170_v0  ;;  %v840_v49 = vsub.f32 %v1170_v0, %v1480_v36  ;;  %v784_v59 = vpop.f32.mrb[11].mxu1  ;;  %v894_v33 = vsel %vm52_vm0, %v854_v55, 0.0 }
 0x3c1   :  { %v892_v34 = vsel %vm52_vm0, %v853_v24, 0.0  ;;  %823 = vst.msk [vmem:[#allocation2 + $0x50] sm:$0xff] %vm52_vm0, %v784_v59  ;;  %v839_v50 = vsub.f32 %v784_v59, %v1471_v35 }
 0x3c2   :  { %v893_v63 = vadd.f32 %v892_v34, %v891_v52  ;;  %v856_v17 = vmul.f32 %v840_v49, %v840_v49 }
 0x3c3   :  { %v855_v18 = vmul.f32 %v839_v50, %v839_v50  ;;  %v1173_v53 = vpop.f32.mrb[12].mxu1 }
 0x3c4   :  { %v895_v4 = vadd.f32 %v894_v33, %v893_v63  ;;  %826 = vst.msk [vmem:[#allocation2 + $0x68] sm:$0xff] %vm52_vm0, %v1173_v53  ;;  %v842_v36 = vsub.f32 %v1173_v53, %v1494_v38  ;;  %v794_v62 = vpop.f32.mrb[13].mxu1  ;;  %v898_v41 = vsel %vm52_vm0, %v856_v17, 0.0 }
 0x3c5   :  { %v896_v5 = vsel %vm52_vm0, %v855_v18, 0.0  ;;  %825 = vst.msk [vmem:[#allocation2 + $0x60] sm:$0xff] %vm52_vm0, %v794_v62  ;;  %v841_v35 = vsub.f32 %v794_v62, %v1485_v37 }
 0x3c6   :  { %v897_v58 = vadd.f32 %v896_v5, %v895_v4  ;;  %v858_v1 = vmul.f32 %v842_v36, %v842_v36 }
 0x3c7   :  { %v857_v7 = vmul.f32 %v841_v35, %v841_v35  ;;  %v1176_v2 = vpop.f32.mrb[14].mxu1 }
 0x3c8   :  { %v899_v13 = vadd.f32 %v898_v41, %v897_v58  ;;  %828 = vst.msk [vmem:[#allocation2 + $0x78] sm:$0xff] %vm52_vm0, %v1176_v2  ;;  %v844_v38 = vsub.f32 %v1176_v2, %v1508_v40  ;;  %v804_v48 = vpop.f32.mrb[15].mxu1 }
 0x3c9   :  { %v900_v25 = vsel %vm52_vm0, %v857_v7, 0.0  ;;  %827 = vst.msk [vmem:[#allocation2 + $0x70] sm:$0xff] %vm52_vm0, %v804_v48  ;;  %v843_v37 = vsub.f32 %v804_v48, %v1499_v39 }
 0x3ca   :  { %v901_v44 = vadd.f32 %v900_v25, %v899_v13 }
 0x3cb   :  { %1272 = shalt.err (!%p1269_p4)
}
 0x3cc   :  { %s1273_s30 = scalar_lea.hbm %s1894_s3, 2048 }
 0x3cd   :  { %p1274_p5 = scmp.ne.s32.totalorder %s1894_s3, %s1273_s30  ;;  %p1277_p6 = scmp.lt.u32.totalorder %s1273_s30, %s1894_s3 }
 0x3cf   :  { %p1279_p7 = pnand %p1277_p6, %p1274_p5 }
 0x3d1   :  { %1282 = shalt.err (!%p1279_p7)
}
 0x3d2   :  { %s1287_s9 = smov 128   ;;  %s1288_s10 = smov 8   ;;  %v902_v39 = vsel %vm52_vm0, %v858_v1, 0.0  ;;  %v860_v40 = vmul.f32 %v844_v38, %v844_v38  ;;  %v859_v45 = vmul.f32 %v843_v37, %v843_v37  ;;  %vm914_vm5 = vcmask 253952  }
 0x3d3   :  { %927 = dma.vmem_to_hbm [thread:$0]  %s1860_s2, 2048, %s1894_s3, [#allocation3], %s1287_s9, %s1287_s9, %s1288_s10   ;;  %v903_v3 = vadd.f32 %v902_v39, %v901_v44 }
 0x3d4   :  { %v904_v26 = vsel %vm52_vm0, %v859_v45, 0.0  ;;  %v906_v15 = vsel %vm52_vm0, %v860_v40, 0.0 }
 0x3d5   :  { %v905_v10 = vadd.f32 %v904_v26, %v903_v3 }
 0x3d7   :  { %v907_v16 = vadd.f32 %v906_v15, %v905_v10 }
 0x3d9   :  { %v908_v9 = vrot.slane %v907_v16, 4 }
 0x3db   :  { %v909_v14 = vadd.f32 %v908_v9, %v907_v16 }
 0x3dd   :  { %v910_v56 = vrot.slane %v909_v14, 2 }
 0x3df   :  { %v911_v11 = vadd.f32 %v910_v56, %v909_v14 }
 0x3e1   :  { %v912_v28 = vrot.slane %v911_v11, 1 }
 0x3e3   :  { %v913_v46 = vadd.f32 %v912_v28, %v911_v11 }
 0x3e5   :  { %915 = vst.msk [vmem:[%s1895_s4] sm:$0x1] %vm914_vm5, %v913_v46 }
 0x3e6   :  { %1283 = dma.done.wait [#allocation3], 2048  }
 0x3e7   :  { %1284 = vsyncadd [#allocation3], 4294965248 }
 0x3e8   :  { %935 = vsyncpa [#allocation3], 1 }

</bundles_post_ra>
